<compile_context>
chip_gen: v6e
topology: v6e:2x2x1
jax: 0.10.0
libtpu: 0.0.40
codegen_flags: <defaults>
</compile_context>

<pallas_src>
import jax
import jax.numpy as jnp
from jax.experimental import pallas as pl
from jax.experimental.pallas import tpu as pltpu

# --- Model config implied by the PyTorch module (iris dataset + TH_DEPTH3) ---
INPUT_DIM = 4                     # len(iris.feature_names)
HIDDEN_DIM = 64
OUTPUT_DIM = 3                    # len(iris.target_names)
TH_DEPTH3 = (-0.5, 0.0, 0.5)      # deterministic stand-in for bnn.TH_DEPTH3
DEPTH = len(TH_DEPTH3)            # depth_features
BN_EPS = 1e-5

K1 = DEPTH * INPUT_DIM            # 12 — merged layer-1 contraction dim
OUT_PAD = 8                       # padded output width (>= OUTPUT_DIM); small to cut
                                  # accumulator size and HBM writeback
MAX_TB = 256                      # batch tile (rows) per grid step
# Layer-2 thresholds with the BMAB 1/(DEPTH*INPUT_DIM) scale folded in:
#   h/(DEPTH*INPUT_DIM) >= th  <=>  h >= th * DEPTH*INPUT_DIM
T2_CONST = tuple(float(th) * DEPTH * INPUT_DIM for th in TH_DEPTH3)


def _ceil_div(a, b):
    return -(-a // b)


def model02_kernel(x_ref, t1_ref, w1_ref, w2_ref, o_ref):
    # --- Layer 1 (Binarize + BMAB matmul), fully merged: one compare + one K=12 matmul.
    x = x_ref[...]                                    # (TB, K1) f32, depth-replicated lanes
    t1 = t1_ref[...]                                  # (1, K1) f32 thresholds, BN folded in
    b1 = jnp.where(x >= t1, 1.0, -1.0).astype(jnp.bfloat16)
    h = jnp.dot(b1, w1_ref[...], preferred_element_type=jnp.float32)   # (TB, HIDDEN) f32

    # --- Layer 2 (BMAB output binarization + BMA): per-depth compare + small matmul,
    # accumulated in f32 (scale folded into T2_CONST).
    out = jnp.zeros((x.shape[0], OUT_PAD), jnp.float32)
    for k in range(DEPTH):                            # DEPTH=3, unrolled at trace time
        b2_k = jnp.where(h >= T2_CONST[k], 1.0, -1.0).astype(jnp.bfloat16)
        out = out + jnp.dot(b2_k, w2_ref[k], preferred_element_type=jnp.float32)

    o_ref[...] = out                                  # (TB, OUT_PAD), cols >= OUTPUT_DIM are 0


def model02_forward(x_cat, x_cont, w1, w2):
    # x_cat mirrors the PyTorch forward signature but is unused (as in the reference).
    del x_cat
    B, D = x_cont.shape
    assert D == INPUT_DIM
    x_cont = x_cont.astype(jnp.float32)

    # BatchNorm1d (training-mode batch stats, gamma=1, beta=0) folded into the layer-1
    # binarization thresholds. Global pre-pass keeps stats exact under batch grid-tiling.
    mean = jnp.mean(x_cont, axis=0, keepdims=True)                   # (1, D)
    var = jnp.mean((x_cont - mean) ** 2, axis=0, keepdims=True)      # biased var (BN fwd)
    std = jnp.sqrt(var + BN_EPS)
    ths = jnp.asarray(TH_DEPTH3, jnp.float32).reshape(DEPTH, 1)
    t1 = (mean + ths * std).reshape(1, K1)                           # (1, 12) depth-major

    # Replicate the features along lanes (depth-major) so layer 1 is one K=12 matmul.
    x_rep = jnp.tile(x_cont, (1, DEPTH))                             # (B, 12)

    # Pre-binarize weights to +-1 bf16 (exact in bf16); depth-major row order preserved.
    w1b = jnp.where(w1 >= 0.0, 1.0, -1.0).astype(jnp.bfloat16)       # (12, 64)
    w2b = jnp.where(w2 >= 0.0, 1.0, -1.0).astype(jnp.bfloat16)
    w2b = w2b.reshape(DEPTH, HIDDEN_DIM, OUTPUT_DIM)
    # Zero-pad output columns to OUT_PAD; padded columns contribute 0 and are sliced off.
    w2b = jnp.pad(w2b, ((0, 0), (0, 0), (0, OUT_PAD - OUTPUT_DIM)))

    # Balanced batch tiling: TB multiple of 8 (sublane constraint), capped at MAX_TB,
    # and at least 2 grid steps whenever B >= 16 so v7x megacore can shard the axis.
    num_tiles = max(_ceil_div(B, MAX_TB), 2 if B >= 16 else 1)
    TB = _ceil_div(_ceil_div(B, num_tiles), 8) * 8
    grid_n = _ceil_div(B, TB)
    B_pad = grid_n * TB
    x_in = x_rep if B_pad == B else jnp.pad(x_rep, ((0, B_pad - B), (0, 0)))

    cost = pl.CostEstimate(
        flops=2 * B_pad * (K1 * HIDDEN_DIM + DEPTH * HIDDEN_DIM * OUT_PAD),
        transcendentals=0,
        bytes_accessed=(B_pad * 4 * (K1 + OUT_PAD)
                        + 4 * K1 + 2 * K1 * HIDDEN_DIM
                        + 2 * DEPTH * HIDDEN_DIM * OUT_PAD),
    )

    out = pl.pallas_call(
        model02_kernel,
        out_shape=jax.ShapeDtypeStruct((B_pad, OUT_PAD), jnp.float32),
        grid=(grid_n,),
        in_specs=[
            pl.BlockSpec((TB, K1), lambda i: (i, 0)),
            pl.BlockSpec((1, K1), lambda i: (0, 0)),
            pl.BlockSpec((K1, HIDDEN_DIM), lambda i: (0, 0)),
            pl.BlockSpec((DEPTH, HIDDEN_DIM, OUT_PAD), lambda i: (0, 0, 0)),
        ],
        out_specs=pl.BlockSpec((TB, OUT_PAD), lambda i: (i, 0)),
        compiler_params=pltpu.CompilerParams(
            dimension_semantics=("parallel",)),
        cost_estimate=cost,
    )(x_in, t1, w1b, w2b)

    return out[:B, :OUTPUT_DIM]


if __name__ == "__main__":
    key = jax.random.PRNGKey(0)
    k1, k2, k3, k4 = jax.random.split(key, 4)

    B = 8
    # Continuous features (iris-like scale), categorical features (unused by forward).
    x_cont = jax.random.normal(k1, (B, INPUT_DIM), dtype=jnp.float32) * 2.0 + 1.0
    x_cat = jax.random.randint(k2, (B, 2), 0, 5)

    # Deterministic parameter init (real-valued masters; binarized in the wrapper).
    w1 = jax.random.normal(k3, (DEPTH * INPUT_DIM, HIDDEN_DIM), dtype=jnp.float32)
    w2 = jax.random.normal(k4, (DEPTH * HIDDEN_DIM, OUTPUT_DIM), dtype=jnp.float32)

    out = jax.block_until_ready(model02_forward(x_cat, x_cont, w1, w2))
    assert out.shape == (B, OUTPUT_DIM) and out.dtype == jnp.float32
    print("KERNEL_OK")
</pallas_src>

<mosaic_0001>
module attributes {stable_mosaic.version = 11 : i64} {
  func.func @model02_kernel(%arg0: i32, %arg1: memref<8x12xf32, #tpu.memory_space<vmem>>, %arg2: memref<1x12xf32, #tpu.memory_space<vmem>>, %arg3: memref<12x64xbf16, #tpu.memory_space<vmem>>, %arg4: memref<3x64x8xbf16, #tpu.memory_space<vmem>>, %arg5: memref<8x8xf32, #tpu.memory_space<vmem>>) attributes {dimension_semantics = [#tpu.dimension_semantics<parallel>], iteration_bounds = array<i64: 1>, scalar_prefetch = 0 : i64, scratch_operands = 0 : i64, tpu.core_type = #tpu.core_type<tc>, window_params = [{transform_indices = @transform_0, window_bounds = array<i64: 8, 12>}, {pipeline_mode = #tpu.pipeline_mode<synchronous>, transform_indices = @transform_1, window_bounds = array<i64: 1, 12>}, {pipeline_mode = #tpu.pipeline_mode<synchronous>, transform_indices = @transform_2, window_bounds = array<i64: 12, 64>}, {pipeline_mode = #tpu.pipeline_mode<synchronous>, transform_indices = @transform_3, window_bounds = array<i64: 3, 64, 8>}, {transform_indices = @transform_4, window_bounds = array<i64: 8, 8>}]} {
    %c0 = arith.constant 0 : index
    %c0_0 = arith.constant 0 : index
    %0 = vector.load %arg1[%c0, %c0_0] : memref<8x12xf32, #tpu.memory_space<vmem>>, vector<8x12xf32>
    %c0_1 = arith.constant 0 : index
    %c0_2 = arith.constant 0 : index
    %1 = vector.load %arg2[%c0_1, %c0_2] : memref<1x12xf32, #tpu.memory_space<vmem>>, vector<1x12xf32>
    %2 = vector.broadcast %1 : vector<1x12xf32> to vector<8x12xf32>
    %3 = arith.cmpf oge, %0, %2 : vector<8x12xf32>
    %cst = arith.constant 1.000000e+00 : f32
    %cst_3 = arith.constant -1.000000e+00 : f32
    %4 = vector.broadcast %cst : f32 to vector<8x12xf32>
    %5 = vector.broadcast %cst_3 : f32 to vector<8x12xf32>
    %6 = arith.select %3, %4, %5 : vector<8x12xi1>, vector<8x12xf32>
    %7 = arith.truncf %6 : vector<8x12xf32> to vector<8x12xbf16>
    %c0_4 = arith.constant 0 : index
    %c0_5 = arith.constant 0 : index
    %8 = vector.load %arg3[%c0_4, %c0_5] : memref<12x64xbf16, #tpu.memory_space<vmem>>, vector<12x64xbf16>
    %cst_6 = arith.constant dense<0.000000e+00> : vector<8x64xf32>
    %9 = tpu.matmul %7, %8, %cst_6 {dimension_numbers = #tpu.dot_dimension_numbers<[1], [0], [0], [1], [0, 0, 1, 1], [], []>} : vector<8x12xbf16>, vector<12x64xbf16>, vector<8x64xf32> -> vector<8x64xf32>
    %cst_7 = arith.constant 0.000000e+00 : f32
    %10 = vector.broadcast %cst_7 : f32 to vector<8x8xf32>
    %cst_8 = arith.constant -6.000000e+00 : f32
    %11 = vector.broadcast %cst_8 : f32 to vector<8x64xf32>
    %12 = arith.cmpf oge, %9, %11 : vector<8x64xf32>
    %cst_9 = arith.constant 1.000000e+00 : f32
    %cst_10 = arith.constant -1.000000e+00 : f32
    %13 = vector.broadcast %cst_9 : f32 to vector<8x64xf32>
    %14 = vector.broadcast %cst_10 : f32 to vector<8x64xf32>
    %15 = arith.select %12, %13, %14 : vector<8x64xi1>, vector<8x64xf32>
    %16 = arith.truncf %15 : vector<8x64xf32> to vector<8x64xbf16>
    %c0_11 = arith.constant 0 : index
    %c0_12 = arith.constant 0 : index
    %c0_13 = arith.constant 0 : index
    %17 = vector.load %arg4[%c0_11, %c0_12, %c0_13] : memref<3x64x8xbf16, #tpu.memory_space<vmem>>, vector<1x64x8xbf16>
    %18 = vector.shape_cast %17 : vector<1x64x8xbf16> to vector<64x8xbf16>
    %cst_14 = arith.constant dense<0.000000e+00> : vector<8x8xf32>
    %19 = tpu.matmul %16, %18, %cst_14 {dimension_numbers = #tpu.dot_dimension_numbers<[1], [0], [0], [1], [0, 0, 1, 1], [], []>} : vector<8x64xbf16>, vector<64x8xbf16>, vector<8x8xf32> -> vector<8x8xf32>
    %20 = arith.addf %10, %19 : vector<8x8xf32>
    %cst_15 = arith.constant 0.000000e+00 : f32
    %21 = vector.broadcast %cst_15 : f32 to vector<8x64xf32>
    %22 = arith.cmpf oge, %9, %21 : vector<8x64xf32>
    %cst_16 = arith.constant 1.000000e+00 : f32
    %cst_17 = arith.constant -1.000000e+00 : f32
    %23 = vector.broadcast %cst_16 : f32 to vector<8x64xf32>
    %24 = vector.broadcast %cst_17 : f32 to vector<8x64xf32>
    %25 = arith.select %22, %23, %24 : vector<8x64xi1>, vector<8x64xf32>
    %26 = arith.truncf %25 : vector<8x64xf32> to vector<8x64xbf16>
    %c1 = arith.constant 1 : index
    %c0_18 = arith.constant 0 : index
    %c0_19 = arith.constant 0 : index
    %27 = vector.load %arg4[%c1, %c0_18, %c0_19] : memref<3x64x8xbf16, #tpu.memory_space<vmem>>, vector<1x64x8xbf16>
    %28 = vector.shape_cast %27 : vector<1x64x8xbf16> to vector<64x8xbf16>
    %cst_20 = arith.constant dense<0.000000e+00> : vector<8x8xf32>
    %29 = tpu.matmul %26, %28, %cst_20 {dimension_numbers = #tpu.dot_dimension_numbers<[1], [0], [0], [1], [0, 0, 1, 1], [], []>} : vector<8x64xbf16>, vector<64x8xbf16>, vector<8x8xf32> -> vector<8x8xf32>
    %30 = arith.addf %20, %29 : vector<8x8xf32>
    %cst_21 = arith.constant 6.000000e+00 : f32
    %31 = vector.broadcast %cst_21 : f32 to vector<8x64xf32>
    %32 = arith.cmpf oge, %9, %31 : vector<8x64xf32>
    %cst_22 = arith.constant 1.000000e+00 : f32
    %cst_23 = arith.constant -1.000000e+00 : f32
    %33 = vector.broadcast %cst_22 : f32 to vector<8x64xf32>
    %34 = vector.broadcast %cst_23 : f32 to vector<8x64xf32>
    %35 = arith.select %32, %33, %34 : vector<8x64xi1>, vector<8x64xf32>
    %36 = arith.truncf %35 : vector<8x64xf32> to vector<8x64xbf16>
    %c2 = arith.constant 2 : index
    %c0_24 = arith.constant 0 : index
    %c0_25 = arith.constant 0 : index
    %37 = vector.load %arg4[%c2, %c0_24, %c0_25] : memref<3x64x8xbf16, #tpu.memory_space<vmem>>, vector<1x64x8xbf16>
    %38 = vector.shape_cast %37 : vector<1x64x8xbf16> to vector<64x8xbf16>
    %cst_26 = arith.constant dense<0.000000e+00> : vector<8x8xf32>
    %39 = tpu.matmul %36, %38, %cst_26 {dimension_numbers = #tpu.dot_dimension_numbers<[1], [0], [0], [1], [0, 0, 1, 1], [], []>} : vector<8x64xbf16>, vector<64x8xbf16>, vector<8x8xf32> -> vector<8x8xf32>
    %40 = arith.addf %30, %39 : vector<8x8xf32>
    %c0_27 = arith.constant 0 : index
    %c0_28 = arith.constant 0 : index
    %41 = vector.load %arg5[%c0_27, %c0_28] : memref<8x8xf32, #tpu.memory_space<vmem>>, vector<8x8xf32>
    tpu.vector_store %arg5[%c0_27, %c0_28], %40 {strides = array<i32>} : memref<8x8xf32, #tpu.memory_space<vmem>>, vector<8x8xf32>,
    return
  }
  func.func @transform_0(%arg0: i32) -> (i32, i32) {
    %c0_i32 = arith.constant 0 : i32
    %c0_i32_0 = arith.constant 0 : i32
    return %arg0, %c0_i32 : i32, i32
  }
  func.func @transform_1(%arg0: i32) -> (i32, i32) {
    %c0_i32 = arith.constant 0 : i32
    %c0_i32_0 = arith.constant 0 : i32
    %c0_i32_1 = arith.constant 0 : i32
    return %c0_i32, %c0_i32_0 : i32, i32
  }
  func.func @transform_2(%arg0: i32) -> (i32, i32) {
    %c0_i32 = arith.constant 0 : i32
    %c0_i32_0 = arith.constant 0 : i32
    %c0_i32_1 = arith.constant 0 : i32
    return %c0_i32, %c0_i32_0 : i32, i32
  }
  func.func @transform_3(%arg0: i32) -> (i32, i32, i32) {
    %c0_i32 = arith.constant 0 : i32
    %c0_i32_0 = arith.constant 0 : i32
    %c0_i32_1 = arith.constant 0 : i32
    %c0_i32_2 = arith.constant 0 : i32
    return %c0_i32, %c0_i32_0, %c0_i32_1 : i32, i32, i32
  }
  func.func @transform_4(%arg0: i32) -> (i32, i32) {
    %c0_i32 = arith.constant 0 : i32
    %c0_i32_0 = arith.constant 0 : i32
    return %arg0, %c0_i32 : i32, i32
  }
}

</mosaic_0001>

<bundles_post_ra>
// kernel: tpu_custom_call.1
= control target key start
LH: loop header
LB: loop body
LE: loop exit
PB: predicated region body
PF: predicated region fallthrough
CT: control target
= control target key end

     0   :  { %vm41_vm0 = vcmask 1045504   ;;  %v471_v0 = vmov 0.0   ;;  %vm472_vm1 = vmmov 0   ;;  %vm37_vm3 = vcmask 97280   ;;  %s572_s0 = inlined_call_operand.vmem [shape: f32[8,12], index: 0, kind: input, shape index: {}]   ;;  %s573_s1 = inlined_call_operand.vmem [shape: f32[1,12], index: 1, kind: input, shape index: {}]   ;;  %s574_s2 = inlined_call_operand.vmem [shape: bf16[12,64], index: 2, kind: input, shape index: {}]   ;;  %s575_s3 = inlined_call_operand.vmem [shape: bf16[3,64,8], index: 3, kind: input, shape index: {}]   ;;  %s576_s4 = inlined_call_operand.hbm [shape: f32[8,8], index: 4, kind: output, shape index: {}]  }
   0x1   :  { %390 = vmatprep.subr.bf16.mxu0 %v471_v0  ;;  %v436_v1 = vld [vmem:[%s574_s2] sm:$0x3f]   ;;  %396 = vmatprep.subr.bf16.mxu1 %v471_v0  ;;  %v473_v5 = vmov -1.0   ;;  %v437_v7 = vld [vmem:[%s575_s3 + $0x38] sm:$0xff]   ;;  %v439_v10 = vld [vmem:[%s575_s3 + $0x30] sm:$0xff]  }
   0x2   :  { %v19_v2 = vld [vmem:[%s572_s0] sm:$0xff]  ;;  %392 = vmatprep.mubr.msk.bf16.mxu0 %vm472_vm1, %v471_v0  ;;  %404 = vmatprep.mubr.msk.bf16.mxu1 %vm472_vm1, %v471_v0  ;;  %v43_v4 = vsel %vm41_vm0, %v436_v1, 0  ;;  %v438_v8 = vld [vmem:[%s575_s3 + $0x18] sm:$0xff]   ;;  %v440_v11 = vld [vmem:[%s575_s3 + $0x10] sm:$0xff]  }
   0x3   :  { %v339_v3 = vld [vmem:[%s573_s1] ss:$0 sm:$0xff]  ;;  %391 = vmatpush3.bf16.msra.mxu0 %v43_v4  ;;  %397 = vmatpush3.bf16.msra.mxu1 %v437_v7  ;;  %v441_v12 = vld [vmem:[%s575_s3 + $0x28] sm:$0xff]  }
   0x4   :  { %vm27_vm2 = vcmp.ge.f32.partialorder %v19_v2, %v339_v3  ;;  %408 = vmatprep.subr.bf16.mxu0 %v471_v0  ;;  %398 = vmatprep.subr.bf16.mxu1 %v471_v0  ;;  %v442_v13 = vld [vmem:[%s575_s3 + $0x8] sm:$0xff]  }
   0x5   :  { %v28_v6 = vsel %vm27_vm2, 1.0, %v473_v5 }
   0x6   :  { %v29_v9 = vpack.c.bf16 %v28_v6, %v28_v6 }
   0x7   :  { %399 = vmatpush3.bf16.msra.mxu1 %v439_v10 }
   0x8   :  { %393 = vmatmul.mubr.msk.bf16.vlgmr.msra.gmra.mxu0 %vm37_vm3, %v29_v9  ;;  %400 = vmatprep.subr.bf16.mxu1 %v471_v0 }
   0x9   :  { %409 = vmatpush3.bf16.msra.mxu0 %v438_v8  ;;  %416 = vmatprep.mubr.msk.bf16.mxu0 %vm472_vm1, %v471_v0 }
   0xa   :  { %410 = vmatprep.subr.bf16.mxu0 %v471_v0 }
   0xd   :  { %411 = vmatpush3.bf16.msra.mxu0 %v440_v11 }
   0xe   :  { %9 = vsyncpa [#allocation3], 0  ;;  %401 = vmatpush3.bf16.msra.mxu1 %v441_v12  ;;  %412 = vmatprep.subr.bf16.mxu0 %v471_v0  ;;  %v443_v14 = vld [vmem:[%s575_s3 + $0x20] sm:$0xff]   ;;  %vm132_vm6 = vcmask 523264   ;;  %v445_v20 = vld [vmem:[%s575_s3 + $0x58] sm:$0xff]   ;;  %s474_s16 = smov [#allocation2]  }
   0xf   :  { %402 = vmatprep.subr.bf16.mxu1 %v471_v0  ;;  %v444_v15 = vld [vmem:[%s575_s3] sm:$0xff]   ;;  %v446_v25 = vld [vmem:[%s575_s3 + $0x50] sm:$0xff]   ;;  %v447_v26 = vld [vmem:[%s575_s3 + $0x48] sm:$0xff]   ;;  %s331_s17 = sshll.u32 %s474_s16, 4  ;;  %vm323_vm8 = vcmask 64512   ;;  %s332_s17 = int_to_ptr.vmem [resolvable:$true] %s331_s17 }
  0x10   :  { %v448_v27 = vld [vmem:[%s575_s3 + $0x40] sm:$0xff]   ;;  %s449_s3 = scalar_lea.vmem %s332_s17, 128  ;;  %p454_p1 = scmp.lt.s32.totalorder %s332_s17, %s332_s17 }
  0x11   :  { %413 = vmatpush3.bf16.msra.mxu0 %v442_v13  ;;  %p450_p0 = scmp.ne.s32.totalorder %s332_s17, %s449_s3  ;;  %p455_p2 = scmp.lt.s32.totalorder %s449_s3, %s449_s3 }
  0x12   :  { %414 = vmatprep.subr.bf16.mxu0 %v471_v0  ;;  %403 = vmatpush3.bf16.msra.mxu1 %v443_v14 }
  0x13   :  { %420 = vmatprep.subr.bf16.mxu1 %v471_v0  ;;  %p456_p3 = por %p455_p2, %p454_p1 }
  0x15   :  { %415 = vmatpush3.bf16.msra.mxu0 %v444_v15  ;;  %p457_p4 = pnand %p456_p3, %p450_p0 }
  0xc8   :  { %v79_v16 = vpop.f32.mrf.mxu0 }
  0xc9   :  { %vm85_vm4 = vcmp.ge.f32.partialorder %v79_v16, -6.0  ;;  %vm96_vm5 = vcmp.ge.f32.partialorder %v79_v16, 0.0  ;;  %vm243_vm7 = vcmp.ge.f32.partialorder %v79_v16, 6.0 }
  0xca   :  { %v86_v17 = vsel %vm85_vm4, 1.0, %v473_v5  ;;  %v97_v18 = vsel %vm96_vm5, 1.0, %v473_v5  ;;  %v394_v19 = vpop.f32.mrf.mxu0  ;;  %v244_v28 = vsel %vm243_vm7, 1.0, %v473_v5 }
  0xcb   :  { %v87_v21 = vpack.c.bf16 %v86_v17, %v86_v17  ;;  %v98_v22 = vpack.c.bf16 %v97_v18, %v97_v18  ;;  %v245_v29 = vpack.c.bf16 %v244_v28, %v244_v28 }
  0xcc   :  { %v82_v23 = vpop.f32.mrf.mxu0 }
  0xcd   :  { %405 = vmatmul.mubr.msk.bf16.vlgmr.msra.gmra.mxu1 %vm132_vm6, %v98_v22  ;;  %417 = vmatmul.mubr.msk.bf16.vlgmr.msra.gmra.mxu0 %vm132_vm6, %v87_v21 }
  0xce   :  { %421 = vmatpush3.bf16.msra.mxu1 %v445_v20  ;;  %v395_v24 = vpop.f32.mrf.mxu0  ;;  %428 = vmatprep.mubr.msk.bf16.mxu1 %vm472_vm1, %v471_v0 }
  0xcf   :  { %422 = vmatprep.subr.bf16.mxu1 %v471_v0 }
  0xd2   :  { %423 = vmatpush3.bf16.msra.mxu1 %v446_v25 }
  0xd3   :  { %424 = vmatprep.subr.bf16.mxu1 %v471_v0 }
  0xd6   :  { %425 = vmatpush3.bf16.msra.mxu1 %v447_v26 }
  0xd7   :  { %426 = vmatprep.subr.bf16.mxu1 %v471_v0 }
  0xda   :  { %427 = vmatpush3.bf16.msra.mxu1 %v448_v27 }
  0xdd   :  { %429 = vmatmul.mubr.msk.bf16.vlgmr.msra.gmra.mxu1 %vm132_vm6, %v245_v29 }
 0x18d   :  { %v170_v30 = vpop.f32.mrf.mxu1  ;;  %v237_v31 = vpop.f32.mrf.mxu0 }
 0x18e   :  { %v238_v38 = vadd.f32 %v237_v31, %v170_v30 }
 0x18f   :  { %v406_v32 = vpop.f32.mrf.mxu1  ;;  %v418_v33 = vpop.f32.mrf.mxu0 }
 0x191   :  { %v173_v34 = vpop.f32.mrf.mxu1  ;;  %v240_v35 = vpop.f32.mrf.mxu0 }
 0x193   :  { %v407_v36 = vpop.f32.mrf.mxu1  ;;  %v419_v37 = vpop.f32.mrf.mxu0 }
 0x19d   :  { %v316_v39 = vpop.f32.mrf.mxu1 }
 0x19e   :  { %v322_v40 = vadd.f32 %v316_v39, %v238_v38 }
 0x19f   :  { %v430_v41 = vpop.f32.mrf.mxu1 }
 0x1a0   :  { %324 = vst.msk [vmem:[#allocation2] sm:$0xff] %vm323_vm8, %v322_v40 }
 0x1a1   :  { %v319_v42 = vpop.f32.mrf.mxu1 }
 0x1a2   :  { %460 = shalt.err (!%p457_p4)
}
 0x1a3   :  { %334 = dma.vmem_to_hbm [thread:$0]  %s332_s17, 128, %s576_s4, [#allocation3]   ;;  %v431_v43 = vpop.f32.mrf.mxu1 }
 0x1a4   :  { %469 = dma.done.wait [#allocation3], 128  }
 0x1a5   :  { %470 = vsyncadd [#allocation3], 4294967168 }
 0x1a6   :  { %338 = vsyncpa [#allocation3], 1 }

</bundles_post_ra>
